<compile_context>
chip_gen: v5e
topology: v5e:2x2
jax: 0.10.0
libtpu: 0.0.40
codegen_flags: <defaults>
</compile_context>

<pallas_src>
import functools

import jax
import jax.numpy as jnp
from jax.experimental import pallas as pl
from jax.experimental.pallas import tpu as pltpu


_TILE_BYTES = 4 * 1024 * 1024        # ~4 MiB per block (16 MiB double-buffered in+out)
_MIN_TILES = 8                       # aim for >=8 blocks: pipelining + v7x megacore
_COL_CHOICES = (1024, 512, 256, 128)  # lane-dense widths (multiples of 128)


def _round_up(a, b):
    return (a + b - 1) // b * b


def _myfloor_kernel(up_ref, x_ref, o_ref, *, t, t_is_pow2):
    # `up` is the learnable scalar parameter, resident in SMEM.
    up = up_ref[0]
    x = x_ref[...].astype(jnp.float32)   # bf16 inputs upcast for the math
    # Keep exact reference op order; true divide by `up` for bit-parity at
    # floor() half-step boundaries.
    z = x / up
    z = jnp.floor(z * t + 0.5)
    if t_is_pow2:
        z = z * (1.0 / t)                # exact for power-of-two t
    else:
        z = z / t
    z = jnp.clip(z, 0.0, 1.0)
    o_ref[...] = (z * up).astype(o_ref.dtype)
    # TODO(synk): GradFloor backward (straight-through estimator) is a
    # training-time autograd concern; forward-only here.


@functools.partial(jax.jit, static_argnames=("t",))
def myfloor(x, up, t=32):
    """MyFloor forward pass.

    Args:
      x:  jnp array, any shape (e.g. NCHW), float32 or bfloat16.
      up: jnp array of shape (1,), the learnable `up` parameter.
      t:  int quantization steps (static).
    """
    orig_shape = x.shape
    dtype = x.dtype
    total = x.size
    itemsize = jnp.dtype(dtype).itemsize
    sublane = {4: 8, 2: 16, 1: 32}.get(itemsize, 8)

    # Pick widest lane-dense column count that divides the element count; only
    # pad (by < cols elements) in the fallback case.
    cols = None
    for c in _COL_CHOICES:
        if total % c == 0:
            cols = c
            break

    flat = x.reshape(-1)
    if cols is None:
        cols = _COL_CHOICES[-1]
        padded_total = _round_up(total, cols)
        flat = jnp.pad(flat, (0, padded_total - total))
    else:
        padded_total = total
    rows = padded_total // cols
    x2d = flat.reshape(rows, cols)

    # Tile-row selection: ~4 MiB blocks, but ensure several blocks exist for
    # small/medium inputs so DMA overlaps compute and v7x megacore is engaged.
    if rows <= sublane:
        tile_rows = rows                 # tiny input: single full-dim block
    else:
        max_tile_rows = max(
            sublane, (_TILE_BYTES // (cols * itemsize)) // sublane * sublane)
        target = _round_up(pl.cdiv(rows, _MIN_TILES), sublane)
        tile_rows = max(sublane, min(max_tile_rows, target))
    grid = (pl.cdiv(rows, tile_rows),)   # last block may be partial (masked)

    t_is_pow2 = (t > 0) and ((t & (t - 1)) == 0)
    up32 = up.astype(jnp.float32)

    out = pl.pallas_call(
        functools.partial(_myfloor_kernel, t=float(t), t_is_pow2=t_is_pow2),
        out_shape=jax.ShapeDtypeStruct((rows, cols), dtype),
        grid_spec=pltpu.PrefetchScalarGridSpec(
            num_scalar_prefetch=0,
            grid=grid,
            in_specs=[
                pl.BlockSpec(memory_space=pltpu.MemorySpace.SMEM),   # up scalar
                pl.BlockSpec((tile_rows, cols), lambda i: (i, 0)),   # x tile
            ],
            out_specs=pl.BlockSpec((tile_rows, cols), lambda i: (i, 0)),
        ),
        compiler_params=pltpu.CompilerParams(
            dimension_semantics=("parallel",),
            vmem_limit_bytes=32 * 1024 * 1024,
        ),
    )(up32, x2d)

    flat_out = out.reshape(-1)
    if padded_total != total:
        flat_out = flat_out[:total]
    return flat_out.reshape(orig_shape)


def myfloor_ref(x, up, t=32):
    """Pure-JAX reference for correctness checking."""
    u = up[0]
    z = x / u
    z = jnp.floor(z * t + 0.5) / t
    z = jnp.clip(z, 0.0, 1.0)
    return z * u


if __name__ == "__main__":
    key = jax.random.PRNGKey(0)
    # Module __init__: up=2.0 (learnable scalar), t=32
    up = jnp.array([2.0], dtype=jnp.float32)
    t = 32

    # Small NCHW input consistent with a conv activation.
    x = jax.random.normal(key, (2, 4, 16, 16), dtype=jnp.float32) * 2.0
    y = jax.block_until_ready(myfloor(x, up, t))
    y_ref = myfloor_ref(x, up, t)
    assert y.shape == x.shape and y.dtype == x.dtype
    assert jnp.allclose(y, y_ref, atol=1e-6), "mismatch vs reference"

    # Also exercise the non-dividing / partial-last-block fallback path.
    x2 = jax.random.normal(jax.random.PRNGKey(1), (3, 4, 20, 20),
                           dtype=jnp.float32) * 2.0
    y2 = jax.block_until_ready(myfloor(x2, up, t))
    assert jnp.allclose(y2, myfloor_ref(x2, up, t), atol=1e-6), "mismatch (pad path)"

    print("KERNEL_OK")
</pallas_src>

<mosaic_0001>
module attributes {stable_mosaic.version = 11 : i64} {
  func.func @_myfloor_kernel(%arg0: i32, %arg1: memref<1xf32, #tpu.memory_space<smem>>, %arg2: memref<2x1024xf32, #tpu.memory_space<vmem>>, %arg3: memref<2x1024xf32, #tpu.memory_space<vmem>>) attributes {dimension_semantics = [#tpu.dimension_semantics<parallel>], iteration_bounds = array<i64: 1>, scalar_prefetch = 0 : i64, scratch_operands = 0 : i64, tpu.core_type = #tpu.core_type<tc>, window_params = [{transform_indices = @transform_0, window_bounds = array<i64: 1>}, {transform_indices = @transform_1, window_bounds = array<i64: 2, 1024>}, {transform_indices = @transform_2, window_bounds = array<i64: 2, 1024>}]} {
    %c0 = arith.constant 0 : index
    %0 = memref.load %arg1[%c0] : memref<1xf32, #tpu.memory_space<smem>>
    %c0_0 = arith.constant 0 : index
    %c0_1 = arith.constant 0 : index
    %1 = vector.load %arg2[%c0_0, %c0_1] : memref<2x1024xf32, #tpu.memory_space<vmem>>, vector<2x1024xf32>
    %2 = vector.broadcast %0 : f32 to vector<2x1024xf32>
    %3 = arith.divf %1, %2 : vector<2x1024xf32>
    %cst = arith.constant 3.200000e+01 : f32
    %4 = vector.broadcast %cst : f32 to vector<2x1024xf32>
    %5 = arith.mulf %3, %4 : vector<2x1024xf32>
    %cst_2 = arith.constant 5.000000e-01 : f32
    %6 = vector.broadcast %cst_2 : f32 to vector<2x1024xf32>
    %7 = arith.addf %5, %6 : vector<2x1024xf32>
    %8 = math.floor %7 : vector<2x1024xf32>
    %cst_3 = arith.constant 3.125000e-02 : f32
    %9 = vector.broadcast %cst_3 : f32 to vector<2x1024xf32>
    %10 = arith.mulf %8, %9 : vector<2x1024xf32>
    %cst_4 = arith.constant 0.000000e+00 : f32
    %cst_5 = arith.constant 1.000000e+00 : f32
    %11 = vector.broadcast %cst_4 : f32 to vector<2x1024xf32>
    %12 = arith.maximumf %11, %10 : vector<2x1024xf32>
    %13 = vector.broadcast %cst_5 : f32 to vector<2x1024xf32>
    %14 = arith.minimumf %13, %12 : vector<2x1024xf32>
    %15 = vector.broadcast %0 : f32 to vector<2x1024xf32>
    %16 = arith.mulf %14, %15 : vector<2x1024xf32>
    %c0_6 = arith.constant 0 : index
    %c0_7 = arith.constant 0 : index
    %17 = vector.load %arg3[%c0_6, %c0_7] : memref<2x1024xf32, #tpu.memory_space<vmem>>, vector<2x1024xf32>
    tpu.vector_store %arg3[%c0_6, %c0_7], %16 {strides = array<i32>} : memref<2x1024xf32, #tpu.memory_space<vmem>>, vector<2x1024xf32>,
    return
  }
  func.func @transform_0(%arg0: i32) -> i32 {
    %c0_i32 = arith.constant 0 : i32
    %c0_i32_0 = arith.constant 0 : i32
    return %c0_i32 : i32
  }
  func.func @transform_1(%arg0: i32) -> (i32, i32) {
    %c0_i32 = arith.constant 0 : i32
    %c0_i32_0 = arith.constant 0 : i32
    return %arg0, %c0_i32 : i32, i32
  }
  func.func @transform_2(%arg0: i32) -> (i32, i32) {
    %c0_i32 = arith.constant 0 : i32
    %c0_i32_0 = arith.constant 0 : i32
    return %arg0, %c0_i32 : i32, i32
  }
}

</mosaic_0001>

<bundles_post_ra>
// kernel: myfloor.1
= control target key start
LH: loop header
LB: loop body
LE: loop exit
PB: predicated region body
PF: predicated region fallthrough
CT: control target
= control target key end

     0   :  { %s84_s0 = inlined_call_operand.<no memory space> [shape: f32[1], index: 0, kind: input, shape index: {}]   ;;  %s85_s1 = inlined_call_operand.vmem [shape: f32[2,1024], index: 1, kind: input, shape index: {}]   ;;  %s86_s2 = inlined_call_operand.vmem [shape: f32[2,1024], index: 2, kind: output, shape index: {}]  }
   0x1   :  { %v15_v0 = vstv %s84_s0  ;;  %v13_v9 = vld [vmem:[%s85_s1] sm:$0xff]  ;;  %v14_v10 = vld [vmem:[%s85_s1 + $0x8] sm:$0xff] }
   0x2   :  { %52 = vrcp.f32 %v15_v0  ;;  %v27_v3 = vand.u32 2147483648, %v15_v0  ;;  %vm21_vm0 = vweird.f32 %v15_v0  ;;  %v25_v5 = vand.u32 2147483647, %v15_v0 }
   0x4   :  { %v28_v7 = vor.u32 1.1754944e-38, %v27_v3  ;;  %vm26_vm3 = vcmp.eq.f32.partialorder %v25_v5, 8.507059e+37 }
   0x8   :  { %v53_v1 = vpop.eup %52 }
   0x9   :  { %v17_v2 = vmul.f32 %v53_v1, %v15_v0  ;;  %vm22_vm1 = vweird.f32 %v53_v1 }
   0xa   :  { %vm23_vm2 = vmor %vm21_vm0, %vm22_vm1 }
   0xb   :  { %v18_v4 = vsub.f32 1.0, %v17_v2 }
   0xd   :  { %v19_v6 = vmul.f32 %v53_v1, %v18_v4 }
   0xf   :  { %v20_v8 = vadd.f32 %v53_v1, %v19_v6 }
  0x11   :  { %v24_v11 = vsel %vm23_vm2, %v53_v1, %v20_v8 }
  0x12   :  { %v29_v12 = vsel %vm26_vm3, %v28_v7, %v24_v11 }
  0x13   :  { %v30_v13 = vmul.f32 %v29_v12, %v13_v9  ;;  %v31_v14 = vmul.f32 %v29_v12, %v14_v10 }
  0x15   :  { %v32_v15 = vmul.f32 32.0, %v30_v13  ;;  %v33_v16 = vmul.f32 32.0, %v31_v14 }
  0x17   :  { %v34_v17 = vadd.f32 0.5, %v32_v15  ;;  %v35_v18 = vadd.f32 0.5, %v33_v16 }
  0x19   :  { %v36_v19 = vfloor.f32 %v34_v17  ;;  %v37_v20 = vfloor.f32 %v35_v18 }
  0x1b   :  { %v38_v21 = vmul.f32 0.03125, %v36_v19  ;;  %v39_v22 = vmul.f32 0.03125, %v37_v20 }
  0x1d   :  { %v40_v23 = vmax.f32 %v38_v21, 0.0  ;;  %v41_v24 = vmax.f32 %v39_v22, 0.0 }
  0x1f   :  { %v42_v25 = vmin.f32 %v40_v23, 1.0  ;;  %v43_v26 = vmin.f32 %v41_v24, 1.0 }
  0x21   :  { %v44_v27 = vmul.f32 %v42_v25, %v15_v0  ;;  %v45_v28 = vmul.f32 %v43_v26, %v15_v0 }
  0x23   :  { %46 = vst [vmem:[%s86_s2] sm:$0xff] %v44_v27 }
  0x24   :  { %47 = vst [vmem:[%s86_s2 + $0x8] sm:$0xff] %v45_v28 }

</bundles_post_ra>
